<compile_context>
chip_gen: v5e
topology: v5e:2x2
jax: 0.10.0
libtpu: 0.0.40
codegen_flags: <defaults>
</compile_context>

<pallas_src>
import functools
import math

import jax
import jax.numpy as jnp
from jax.experimental import pallas as pl
from jax.experimental.pallas import tpu as pltpu


def gcn_kernel(a_ref, h_ref, w_ref, o_ref):
    """A block of BG graphs per grid step.

    a_ref: (BG, N, N)   dense adjacency block
    h_ref: (BG, N, F)   node-feature block
    w_ref: (F, FP)      weight, zero-padded along lanes to FP (multiple of 128)
    o_ref: (BG, N, FP)  lane-dense output block (padding columns stay zero)
    """
    A = a_ref[...]                        # (BG, N, N) f32
    H = h_ref[...]                        # (BG, N, F) f32
    W = w_ref[...]                        # (F, FP)    f32

    BG, N, F = H.shape
    FP = W.shape[-1]

    # Degrees of A_hat = A + I without materializing I: rowsum(A) + 1.
    d = jnp.sum(A, axis=2, keepdims=True) + 1.0               # (BG, N, 1) XLU reduce
    d_inv_sqrt = jax.lax.rsqrt(d)                              # (BG, N, 1) EUP rsqrt

    # Feature transform fused across the batch: one (BG*N, F) @ (F, FP) MXU
    # pass instead of BG tiny matmuls; lane-dense because W is padded to FP.
    HW = jnp.dot(
        H.reshape(BG * N, F), W, preferred_element_type=jnp.float32
    ).reshape(BG, N, FP)                                       # (BG, N, FP)

    # D^{-1/2} (A + I) D^{-1/2} @ HW  ==  dis * (A @ (dis * HW) + dis * HW)
    # (diag matrices factored into row-broadcast scalings; A_hat never built).
    scaled = d_inv_sqrt * HW                                   # (BG, N, FP)
    AHW = d_inv_sqrt * (
        jnp.einsum("bij,bjf->bif", A, scaled, preferred_element_type=jnp.float32)
        + scaled
    )

    # ReLU, full-lane store.
    o_ref[...] = jnp.maximum(AHW, 0.0).astype(o_ref.dtype)


@functools.partial(jax.jit, static_argnames=())
def gcn_forward(A, H, W):
    """Batched GCN forward (jitted: pad / kernel / un-pad fuse into one dispatch).

    A: (B, N, N) or (N, N) float adjacency
    H: (B, N, F) or (N, F) float features
    W: (F, F)    weight
    Returns (B, N, F) (or (N, F) if unbatched inputs).
    """
    A = jnp.asarray(A, jnp.float32)
    H = jnp.asarray(H, jnp.float32)
    W = jnp.asarray(W, jnp.float32)

    squeeze = A.ndim == 2
    if squeeze:
        A, H = A[None], H[None]

    B, N, _ = A.shape
    F_in = H.shape[-1]
    F_out = W.shape[-1]

    # Two parallel grid steps when possible (keeps both v7x TensorCores busy);
    # otherwise a single step holding every graph (optimal on 1-TC v5e/v6e and
    # still correct everywhere).
    num_steps = 2 if (B % 2 == 0 and B >= 2) else 1
    BG = B // num_steps

    # Pad the weight's output dim to a lane-dense width (multiple of 128) so
    # all matmul results and the final store are full-lane (unmasked vst).
    FP = ((F_out + 127) // 128) * 128
    W_pad = jnp.zeros((F_in, FP), jnp.float32).at[:, :F_out].set(W)

    out = pl.pallas_call(
        gcn_kernel,
        out_shape=jax.ShapeDtypeStruct((B, N, FP), jnp.float32),
        grid_spec=pltpu.PrefetchScalarGridSpec(
            num_scalar_prefetch=0,
            grid=(num_steps,),
            in_specs=[
                pl.BlockSpec((BG, N, N), lambda b: (b, 0, 0)),      # graph block A
                pl.BlockSpec((BG, N, F_in), lambda b: (b, 0, 0)),   # graph block H
                pl.BlockSpec((F_in, FP), lambda b: (0, 0)),         # shared W
            ],
            out_specs=pl.BlockSpec((BG, N, FP), lambda b: (b, 0, 0)),
        ),
        compiler_params=pltpu.CompilerParams(
            dimension_semantics=("parallel",),
        ),
    )(A, H, W_pad)

    out = out[..., :F_out]
    if squeeze:
        out = out[0]
    return out


def gcn_reference(A, H, W):
    """Pure-JAX reference matching the PyTorch module's forward (one graph)."""
    N = A.shape[0]
    A_hat = A + jnp.eye(N, dtype=A.dtype)
    d = jnp.sum(A_hat, axis=1)
    D_inv_sqrt = jnp.diag(d ** -0.5)
    A_norm = D_inv_sqrt @ A_hat @ D_inv_sqrt
    return jax.nn.relu(A_norm @ (H @ W))


if __name__ == "__main__":
    key = jax.random.PRNGKey(0)
    k_a, k_h, k_w = jax.random.split(key, 3)

    B = 4            # graphs per call (2 parallel grid steps of 2 graphs each)
    N = 8            # nodes per graph
    F = 5            # in_features == out_features == 5 (from the module)

    # Deterministic synthetic symmetric adjacencies with zero diagonal.
    upper = (jax.random.uniform(k_a, (B, N, N)) > 0.5).astype(jnp.float32)
    upper = jnp.triu(upper, k=1)
    A = upper + jnp.swapaxes(upper, -1, -2)

    # Node features.
    H = jax.random.normal(k_h, (B, N, F), dtype=jnp.float32)

    # Weight init: uniform(-stdv, stdv), stdv = 1/sqrt(out_features), as in __init__.
    stdv = 1.0 / math.sqrt(F)
    W = jax.random.uniform(k_w, (F, F), minval=-stdv, maxval=stdv, dtype=jnp.float32)

    out = gcn_forward(A, H, W)
    jax.block_until_ready(out)

    assert out.shape == (B, N, F) and out.dtype == jnp.float32

    # Correctness check against the pure-JAX reference per graph.
    ref = jnp.stack([gcn_reference(A[b], H[b], W) for b in range(B)])
    assert jnp.allclose(out, ref, atol=1e-5, rtol=1e-5), float(
        jnp.max(jnp.abs(out - ref))
    )

    print("KERNEL_OK")
</pallas_src>

<mosaic_0001>
module attributes {stable_mosaic.version = 11 : i64} {
  func.func @gcn_kernel(%arg0: i32, %arg1: memref<2x8x8xf32, #tpu.memory_space<vmem>>, %arg2: memref<2x8x5xf32, #tpu.memory_space<vmem>>, %arg3: memref<5x128xf32, #tpu.memory_space<vmem>>, %arg4: memref<2x8x128xf32, #tpu.memory_space<vmem>>) attributes {dimension_semantics = [#tpu.dimension_semantics<parallel>], iteration_bounds = array<i64: 2>, scalar_prefetch = 0 : i64, scratch_operands = 0 : i64, tpu.core_type = #tpu.core_type<tc>, window_params = [{transform_indices = @transform_0, window_bounds = array<i64: 2, 8, 8>}, {transform_indices = @transform_1, window_bounds = array<i64: 2, 8, 5>}, {pipeline_mode = #tpu.pipeline_mode<synchronous>, transform_indices = @transform_2, window_bounds = array<i64: 5, 128>}, {transform_indices = @transform_3, window_bounds = array<i64: 2, 8, 128>}]} {
    %c0 = arith.constant 0 : index
    %c0_0 = arith.constant 0 : index
    %c0_1 = arith.constant 0 : index
    %0 = vector.load %arg1[%c0, %c0_0, %c0_1] : memref<2x8x8xf32, #tpu.memory_space<vmem>>, vector<2x8x8xf32>
    %c0_2 = arith.constant 0 : index
    %c0_3 = arith.constant 0 : index
    %c0_4 = arith.constant 0 : index
    %1 = vector.load %arg2[%c0_2, %c0_3, %c0_4] : memref<2x8x5xf32, #tpu.memory_space<vmem>>, vector<2x8x5xf32>
    %c0_5 = arith.constant 0 : index
    %c0_6 = arith.constant 0 : index
    %2 = vector.load %arg3[%c0_5, %c0_6] : memref<5x128xf32, #tpu.memory_space<vmem>>, vector<5x128xf32>
    %cst = arith.constant dense<0.000000e+00> : vector<2x8xf32>
    %3 = vector.multi_reduction <add>, %0, %cst [2] : vector<2x8x8xf32> to vector<2x8xf32>
    %4 = vector.shape_cast %3 : vector<2x8xf32> to vector<2x8x1xf32>
    %cst_7 = arith.constant 1.000000e+00 : f32
    %5 = vector.broadcast %cst_7 : f32 to vector<2x8x1xf32>
    %6 = arith.addf %4, %5 : vector<2x8x1xf32>
    %7 = math.rsqrt %6 : vector<2x8x1xf32>
    %8 = vector.shape_cast %1 : vector<2x8x5xf32> to vector<16x5xf32>
    %cst_8 = arith.constant dense<0.000000e+00> : vector<16x128xf32>
    %9 = tpu.matmul %8, %2, %cst_8 {dimension_numbers = #tpu.dot_dimension_numbers<[1], [0], [0], [1], [0, 0, 1, 1], [], []>} : vector<16x5xf32>, vector<5x128xf32>, vector<16x128xf32> -> vector<16x128xf32>
    %10 = vector.shape_cast %9 : vector<16x128xf32> to vector<2x8x128xf32>
    %11 = vector.broadcast %7 : vector<2x8x1xf32> to vector<2x8x128xf32>
    %12 = arith.mulf %11, %10 : vector<2x8x128xf32>
    "tpu.trace_start"() <{level = 10 : i32, message = "bij,bjf->bif"}> : () -> ()
    %cst_9 = arith.constant dense<0.000000e+00> : vector<2x8x128xf32>
    %13 = tpu.matmul %0, %12, %cst_9 {dimension_numbers = #tpu.dot_dimension_numbers<[2], [1], [1], [2], [0, 0, 0, 1, 1, 2], [0], [0]>} : vector<2x8x8xf32>, vector<2x8x128xf32>, vector<2x8x128xf32> -> vector<2x8x128xf32>
    "tpu.trace_stop"() : () -> ()
    %14 = arith.addf %13, %12 : vector<2x8x128xf32>
    %15 = vector.broadcast %7 : vector<2x8x1xf32> to vector<2x8x128xf32>
    %16 = arith.mulf %15, %14 : vector<2x8x128xf32>
    %cst_10 = arith.constant 0.000000e+00 : f32
    %17 = vector.broadcast %cst_10 : f32 to vector<2x8x128xf32>
    %18 = arith.maximumf %16, %17 : vector<2x8x128xf32>
    %c0_11 = arith.constant 0 : index
    %c0_12 = arith.constant 0 : index
    %c0_13 = arith.constant 0 : index
    %19 = vector.load %arg4[%c0_11, %c0_12, %c0_13] : memref<2x8x128xf32, #tpu.memory_space<vmem>>, vector<2x8x128xf32>
    tpu.vector_store %arg4[%c0_11, %c0_12, %c0_13], %18 {strides = array<i32>} : memref<2x8x128xf32, #tpu.memory_space<vmem>>, vector<2x8x128xf32>,
    return
  }
  func.func @transform_0(%arg0: i32) -> (i32, i32, i32) {
    %c0_i32 = arith.constant 0 : i32
    %c0_i32_0 = arith.constant 0 : i32
    %c0_i32_1 = arith.constant 0 : i32
    return %arg0, %c0_i32, %c0_i32_0 : i32, i32, i32
  }
  func.func @transform_1(%arg0: i32) -> (i32, i32, i32) {
    %c0_i32 = arith.constant 0 : i32
    %c0_i32_0 = arith.constant 0 : i32
    %c0_i32_1 = arith.constant 0 : i32
    return %arg0, %c0_i32, %c0_i32_0 : i32, i32, i32
  }
  func.func @transform_2(%arg0: i32) -> (i32, i32) {
    %c0_i32 = arith.constant 0 : i32
    %c0_i32_0 = arith.constant 0 : i32
    %c0_i32_1 = arith.constant 0 : i32
    return %c0_i32, %c0_i32_0 : i32, i32
  }
  func.func @transform_3(%arg0: i32) -> (i32, i32, i32) {
    %c0_i32 = arith.constant 0 : i32
    %c0_i32_0 = arith.constant 0 : i32
    %c0_i32_1 = arith.constant 0 : i32
    return %arg0, %c0_i32, %c0_i32_0 : i32, i32, i32
  }
}

</mosaic_0001>

<bundles_post_ra>
// kernel: gcn_forward.1
= control target key start
LH: loop header
LB: loop body
LE: loop exit
PB: predicated region body
PF: predicated region fallthrough
CT: control target
= control target key end

     0   :  { %s445_s12 = smov 0   ;;  %s477_s0 = inlined_call_operand.vmem [shape: f32[4,8,8], index: 0, kind: input, shape index: {}]   ;;  %s478_s1 = inlined_call_operand.vmem [shape: f32[4,8,5], index: 1, kind: input, shape index: {}]   ;;  %s479_s2 = inlined_call_operand.vmem [shape: f32[5,128], index: 2, kind: input, shape index: {}]   ;;  %s480_s3 = inlined_call_operand.vmem [shape: f32[4,8,128], index: 3, kind: output, shape index: {}]  }
   0x1 LB: > { %s386_s13 = sadd.s32 4294967295, %s423_s12   ;;  %p390_p0 = scmp.ge.s32.totalorder %s423_s12, 1  ;;  %s423_s12 = sphi %s445_s12, %s13_s12  }
   0x2   : > { %p149_p1 = scmp.lt.s32.totalorder %s423_s12, 3 }
   0x4   : > { %p150_p2 = pnand %p390_p0, %p149_p1 }
   0x5   : > { %s391_s14 = sshll.u32 (!%p150_p2), %s386_s13, 1 }
   0x6   : > { %153 = sbr.rel (%p150_p2) target bundleno = 296 (0x128), region = 32  ;;  %p179_p3 = scmp.lt.s32.totalorder (!%p150_p2), %s391_s14, 3 }
   0xb   : > { %v200_v0 = vld [vmem:[%s479_s2] sm:$0x1f]  ;;  %vm237_vm0 = vcmask 1044480   ;;  %s482_s14 = smov (!%p179_p3, %s391_s14), 3  ;;  %vm201_vm1 = vcmask 64512   ;;  %vm230_vm2 = vcmask 39936  }
   0xc   : > { %404 = vmatpush.msk.msra.mxu3 %vm237_vm0, %v200_v0  ;;  %397 = vmatpush.msk.msra.mxu0 %vm237_vm0, %v200_v0  ;;  %s456_s17 = sshll.u32 %s482_s14, 3 }
   0xd   : > { %s182_s20 = scalar_lea.vmem %s477_s0, %s456_s17  ;;  %s188_s23 = scalar_lea.vmem %s478_s1, %s456_s17 }
   0xe   : > { %v197_v1 = vld [vmem:[%s182_s20 + $0x8] sm:$0xff]  ;;  %v198_v4 = vld [vmem:[%s188_s23] sm:$0xff]  ;;  %s194_s26 = scalar_lea.vmem %s480_s3, %s456_s17 }
   0xf   : > { %v199_v2 = vld [vmem:[%s188_s23 + $0x8] sm:$0xff]  ;;  %v205_v3 = vsel %vm201_vm1, %v197_v1, 0.0  ;;  %398 = vmatmul.msk.f32.vlgmr.msra.gmra.mxu0 %vm230_vm2, %v198_v4  ;;  %v196_v5 = vld [vmem:[%s182_s20] sm:$0xff] }
  0x10   : > { %399 = vmatmul.msk.f32.vlgmr.msra.gmra.mxu3 %vm230_vm2, %v199_v2  ;;  %206 = vadd.xlane.f32.xlu0 %v205_v3  ;;  %v202_v6 = vsel %vm201_vm1, %v196_v5, 0.0 }
  0x18   : > { %203 = vadd.xlane.f32.xlu0 %v202_v6 }
  0x83   : > { %v207_v7 = vpop.xlane.xlu0 %206 }
  0x84   : > { %v209_v8 = vadd.f32 1.0, %v207_v7 }
  0x86   : > { %413 = vrsqrt.f32 %v209_v8  ;;  %vm226_vm4 = vweird.f32 %v209_v8 }
  0x8b   : > { %v204_v9 = vpop.xlane.xlu0 %203 }
  0x8c   : > { %v414_v10 = vpop.eup %413  ;;  %v208_v11 = vadd.f32 1.0, %v204_v9  ;;  %v258_v26 = vpop.f32.mrf.mxu0 }
  0x8d   : > { %v221_v12 = vmul.f32 %v414_v10, %v209_v8  ;;  %vm227_vm3 = vweird.f32 %v414_v10 }
  0x8e   : > { %415 = vrsqrt.f32 %v208_v11  ;;  %vm228_vm5 = vmor %vm226_vm4, %vm227_vm3  ;;  %vm216_vm7 = vweird.f32 %v208_v11 }
  0x8f   : > { %v222_v13 = vmul.f32 %v414_v10, %v221_v12 }
  0x91   : > { %v223_v14 = vmul.f32 0.5, %v222_v13 }
  0x93   : > { %v224_v15 = vsub.f32 1.5, %v223_v14  ;;  %v261_v19 = vpop.f32.mrf.mxu3 }
  0x94   : > { %v416_v16 = vpop.eup %415 }
  0x95   : > { %v211_v17 = vmul.f32 %v416_v16, %v208_v11  ;;  %v225_v18 = vmul.f32 %v414_v10, %v224_v15  ;;  %vm217_vm6 = vweird.f32 %v416_v16 }
  0x96   : > { %vm218_vm8 = vmor %vm216_vm7, %vm217_vm6 }
  0x97   : > { %v212_v20 = vmul.f32 %v416_v16, %v211_v17  ;;  %v229_v21 = vsel %vm228_vm5, %v414_v10, %v225_v18 }
  0x98   : > { %v265_v22 = vmul.f32 %v261_v19, %v229_v21 }
  0x99   : > { %v213_v23 = vmul.f32 0.5, %v212_v20 }
  0x9a   : > { %307 = vmatpush.msra.mxu2 %v265_v22 }
  0x9b   : > { %v214_v24 = vsub.f32 1.5, %v213_v23  ;;  %401 = vmatmul.msk.f32.vlgmr.msra.gmra.mxu2 %vm201_vm1, %v197_v1 }
  0x9d   : > { %v215_v25 = vmul.f32 %v416_v16, %v214_v24 }
  0x9f   : > { %v219_v27 = vsel %vm218_vm8, %v416_v16, %v215_v25 }
  0xa0   : > { %v264_v28 = vmul.f32 %v258_v26, %v219_v27 }
  0xa2   : > { %284 = vmatpush.msra.mxu1 %v264_v28 }
  0xa3   : > { %400 = vmatmul.msk.f32.vlgmr.msra.gmra.mxu1 %vm201_vm1, %v196_v5 }
 0x11e   : > { %v309_v29 = vpop.f32.mrf.mxu2 }
 0x11f   : > { %v310_v30 = vadd.f32 %v309_v29, %v265_v22 }
 0x120   : > { %v286_v31 = vpop.f32.mrf.mxu1 }
 0x121   : > { %v287_v32 = vadd.f32 %v286_v31, %v264_v28  ;;  %v313_v33 = vmul.f32 %v310_v30, %v229_v21 }
 0x123   : > { %v312_v34 = vmul.f32 %v287_v32, %v219_v27  ;;  %v315_v36 = vmax.f32 %v313_v33, 0.0 }
 0x125   : > { %v314_v35 = vmax.f32 %v312_v34, 0.0  ;;  %317 = vst [vmem:[%s194_s26 + $0x8] sm:$0xff] %v315_v36 }
 0x127   : > { %316 = vst [vmem:[%s194_s26] sm:$0xff] %v314_v35 }
 0x128 PF: > { %s13_s12 = sadd.s32 1, %s423_s12  }
 0x129   : > { %p10_p4 = scmp.ge.s32.totalorder %s13_s12, 4  }
 0x12b   :  { %12 = sbr.rel (!%p10_p4) target bundleno = 1 (0x1), region = 65 }

</bundles_post_ra>
